<compile_context>
chip_gen: v5e
topology: v5e:2x2
jax: 0.10.0
libtpu: 0.0.40
codegen_flags: <defaults>
</compile_context>

<pallas_src>
import jax
import jax.numpy as jnp
from jax.experimental import pallas as pl
from jax.experimental.pallas import tpu as pltpu


def _round_up(x, m):
    return (x + m - 1) // m * m


def _score_kernel(x_ref, w_ref, b_ref, o_ref):
    # x_ref : (TMP, D_p) VMEM  -- lane-packed rows (G original rows per packed row)
    # w_ref : (D_p, G)   VMEM  -- block-diagonal replication of the Linear weight
    # b_ref : (1, 1)     SMEM  -- bias scalar
    # o_ref : (TMP, G)   VMEM  -- one score per original row
    x = x_ref[...]
    w = w_ref[...]
    b = b_ref[0, 0]
    # K-reduction on the MXU (instead of VPU multiply + XLU lane-reduce).
    scores = jnp.dot(x, w, preferred_element_type=jnp.float32) + b
    o_ref[...] = scores.astype(o_ref.dtype)


def listmle_forward(x, weight, bias, *, tile_bytes=2 * 1024 * 1024):
    """x: (batch, list_size, input_dim); weight: (1, input_dim); bias: (1,)."""
    batch, list_size, input_dim = x.shape
    m = batch * list_size
    d = input_dim

    # Lane-packing factor: fold G rows into one 128-lane-wide packed row when the
    # feature dim is a small divisor of 128; otherwise fall back to G = 1.
    if d < 128 and 128 % d == 0:
        g = 128 // d
    else:
        g = 1
    d_p = g * d

    # Tile over packed rows: ~tile_bytes per input tile (double-buffered by the
    # BlockSpec pipeline) -> well under scoped VMEM on v5e / v6e / v7x.
    mp_raw = pl.cdiv(m, g)
    tmp = max(8, (tile_bytes // (d_p * 4)) // 8 * 8)
    tmp = min(tmp, _round_up(mp_raw, 8))
    mp = _round_up(mp_raw, tmp)
    n_tiles = mp // tmp

    # Pad rows (rows are independent; padded garbage is sliced off below), then
    # pack G consecutive rows per packed row (free, row-major contiguous).
    x2d = x.reshape(m, d)
    m_pad = mp * g
    if m_pad != m:
        x2d = jnp.pad(x2d, ((0, m_pad - m), (0, 0)))
    x_packed = x2d.reshape(mp, d_p)

    # Block-diagonal weight: output column g' = dot(w, lane-group g' of a packed row).
    w_row = weight.reshape(d).astype(x.dtype)
    if g > 1:
        eye = jnp.eye(g, dtype=x.dtype)                                # (G, G)
        w_bd = (eye[:, None, :] * w_row[None, :, None]).reshape(d_p, g)
    else:
        w_bd = w_row.reshape(d_p, 1)
    b2d = bias.reshape(1, 1).astype(jnp.float32)

    cost = pl.CostEstimate(
        flops=2 * m * d,
        transcendentals=0,
        bytes_accessed=(m * d + m + d + 1) * 4,
    )

    scores = pl.pallas_call(
        _score_kernel,
        out_shape=jax.ShapeDtypeStruct((mp, g), x.dtype),
        grid_spec=pltpu.PrefetchScalarGridSpec(
            num_scalar_prefetch=0,
            grid=(n_tiles,),
            in_specs=[
                pl.BlockSpec((tmp, d_p), lambda i: (i, 0)),     # streamed x tiles
                pl.BlockSpec((d_p, g), lambda i: (0, 0)),       # resident weight
                pl.BlockSpec(memory_space=pltpu.MemorySpace.SMEM),  # bias scalar
            ],
            out_specs=pl.BlockSpec((tmp, g), lambda i: (i, 0)),
        ),
        compiler_params=pltpu.CompilerParams(
            dimension_semantics=("parallel",),    # rows independent -> shard across TCs
            vmem_limit_bytes=32 * 1024 * 1024,
        ),
        cost_estimate=cost,
    )(x_packed, w_bd, b2d)

    # Unpack: (mp, g) row-major == original flat row order.
    flat = scores.reshape(m_pad)[:m]
    # PyTorch .squeeze(): (batch, list_size, 1) -> (batch, list_size)
    return flat.reshape(batch, list_size)


if __name__ == "__main__":
    batch, list_size, input_dim = 2, 8, 32

    key = jax.random.PRNGKey(0)
    k_x, k_w, k_b = jax.random.split(key, 3)

    # Deterministic params mimicking nn.Linear's uniform(-1/sqrt(D), 1/sqrt(D)).
    bound = 1.0 / jnp.sqrt(jnp.float32(input_dim))
    weight = jax.random.uniform(k_w, (1, input_dim), jnp.float32, -bound, bound)
    bias = jax.random.uniform(k_b, (1,), jnp.float32, -bound, bound)

    x = jax.random.normal(k_x, (batch, list_size, input_dim), jnp.float32)

    out = jax.block_until_ready(listmle_forward(x, weight, bias))

    # Pure-JAX reference (same semantics as fc(x).squeeze()).
    ref = (x @ weight.T + bias).squeeze(-1)
    assert out.shape == (batch, list_size)
    assert jnp.allclose(out, ref, atol=1e-5, rtol=1e-5)

    print("KERNEL_OK")
</pallas_src>

<mosaic_0001>
module attributes {stable_mosaic.version = 11 : i64} {
  func.func @_score_kernel(%arg0: i32, %arg1: memref<8x128xf32, #tpu.memory_space<vmem>>, %arg2: memref<128x4xf32, #tpu.memory_space<vmem>>, %arg3: memref<1x1xf32, #tpu.memory_space<smem>>, %arg4: memref<8x4xf32, #tpu.memory_space<vmem>>) attributes {dimension_semantics = [#tpu.dimension_semantics<parallel>], iteration_bounds = array<i64: 1>, scalar_prefetch = 0 : i64, scratch_operands = 0 : i64, tpu.core_type = #tpu.core_type<tc>, window_params = [{transform_indices = @transform_0, window_bounds = array<i64: 8, 128>}, {pipeline_mode = #tpu.pipeline_mode<synchronous>, transform_indices = @transform_1, window_bounds = array<i64: 128, 4>}, {transform_indices = @transform_2, window_bounds = array<i64: 1, 1>}, {transform_indices = @transform_3, window_bounds = array<i64: 8, 4>}]} {
    %c0 = arith.constant 0 : index
    %c0_0 = arith.constant 0 : index
    %0 = vector.load %arg1[%c0, %c0_0] : memref<8x128xf32, #tpu.memory_space<vmem>>, vector<8x128xf32>
    %c0_1 = arith.constant 0 : index
    %c0_2 = arith.constant 0 : index
    %1 = vector.load %arg2[%c0_1, %c0_2] : memref<128x4xf32, #tpu.memory_space<vmem>>, vector<128x4xf32>
    %c0_3 = arith.constant 0 : index
    %c0_4 = arith.constant 0 : index
    %2 = memref.load %arg3[%c0_3, %c0_4] : memref<1x1xf32, #tpu.memory_space<smem>>
    %cst = arith.constant dense<0.000000e+00> : vector<8x4xf32>
    %3 = tpu.matmul %0, %1, %cst {dimension_numbers = #tpu.dot_dimension_numbers<[1], [0], [0], [1], [0, 0, 1, 1], [], []>} : vector<8x128xf32>, vector<128x4xf32>, vector<8x4xf32> -> vector<8x4xf32>
    %4 = vector.broadcast %2 : f32 to vector<8x4xf32>
    %5 = arith.addf %3, %4 : vector<8x4xf32>
    %c0_5 = arith.constant 0 : index
    %c0_6 = arith.constant 0 : index
    %6 = vector.load %arg4[%c0_5, %c0_6] : memref<8x4xf32, #tpu.memory_space<vmem>>, vector<8x4xf32>
    tpu.vector_store %arg4[%c0_5, %c0_6], %5 {strides = array<i32>} : memref<8x4xf32, #tpu.memory_space<vmem>>, vector<8x4xf32>,
    return
  }
  func.func @transform_0(%arg0: i32) -> (i32, i32) {
    %c0_i32 = arith.constant 0 : i32
    %c0_i32_0 = arith.constant 0 : i32
    return %arg0, %c0_i32 : i32, i32
  }
  func.func @transform_1(%arg0: i32) -> (i32, i32) {
    %c0_i32 = arith.constant 0 : i32
    %c0_i32_0 = arith.constant 0 : i32
    %c0_i32_1 = arith.constant 0 : i32
    return %c0_i32, %c0_i32_0 : i32, i32
  }
  func.func @transform_2(%arg0: i32) -> (i32, i32) {
    %c0_i32 = arith.constant 0 : i32
    %c0_i32_0 = arith.constant 0 : i32
    %c0_i32_1 = arith.constant 0 : i32
    return %c0_i32, %c0_i32_0 : i32, i32
  }
  func.func @transform_3(%arg0: i32) -> (i32, i32) {
    %c0_i32 = arith.constant 0 : i32
    %c0_i32_0 = arith.constant 0 : i32
    return %arg0, %c0_i32 : i32, i32
  }
}

</mosaic_0001>

<bundles_post_ra>
// kernel: tpu_custom_call.1
= control target key start
LH: loop header
LB: loop body
LE: loop exit
PB: predicated region body
PF: predicated region fallthrough
CT: control target
= control target key end

     0   :  { %vm54_vm0 = vcmask 31744   ;;  %s137_s1 = inlined_call_operand.vmem [shape: f32[128,4], index: 1, kind: input, shape index: {}]   ;;  %s138_s0 = inlined_call_operand.vmem [shape: f32[8,128], index: 0, kind: input, shape index: {}]   ;;  %s139_s2 = inlined_call_operand.<no memory space> [shape: f32[1,1], index: 2, kind: input, shape index: {}]   ;;  %s140_s3 = inlined_call_operand.vmem [shape: f32[8,4], index: 3, kind: output, shape index: {}]  }
   0x1   :  { %v31_v0 = vld [vmem:[%s137_s1 + $0x78] sm:$0xff]  ;;  %v30_v1 = vld [vmem:[%s137_s1 + $0x70] sm:$0xff]  ;;  %v29_v2 = vld [vmem:[%s137_s1 + $0x68] sm:$0xff]  ;;  %v33_v17 = vstv %s139_s2 }
   0x2   :  { %34 = vmatpush.msra.mxu0 %v31_v0  ;;  %v28_v3 = vld [vmem:[%s137_s1 + $0x60] sm:$0xff]  ;;  %v27_v4 = vld [vmem:[%s137_s1 + $0x58] sm:$0xff]  ;;  %v26_v5 = vld [vmem:[%s137_s1 + $0x50] sm:$0xff] }
   0x3   :  { %v25_v6 = vld [vmem:[%s137_s1 + $0x48] sm:$0xff]  ;;  %v24_v7 = vld [vmem:[%s137_s1 + $0x40] sm:$0xff]  ;;  %v23_v8 = vld [vmem:[%s137_s1 + $0x38] sm:$0xff] }
   0x4   :  { %35 = vmatpush.msra.mxu0 %v30_v1  ;;  %v22_v9 = vld [vmem:[%s137_s1 + $0x30] sm:$0xff]  ;;  %v21_v10 = vld [vmem:[%s137_s1 + $0x28] sm:$0xff]  ;;  %v20_v11 = vld [vmem:[%s137_s1 + $0x20] sm:$0xff] }
   0x5   :  { %v19_v12 = vld [vmem:[%s137_s1 + $0x18] sm:$0xff]  ;;  %v18_v13 = vld [vmem:[%s137_s1 + $0x10] sm:$0xff]  ;;  %v17_v14 = vld [vmem:[%s137_s1 + $0x8] sm:$0xff] }
   0x6   :  { %36 = vmatpush.msra.mxu0 %v29_v2  ;;  %v16_v15 = vld [vmem:[%s137_s1] sm:$0xff] }
   0x7   :  { %v15_v16 = vld [vmem:[%s138_s0] sm:$0xff] }
   0x8   :  { %37 = vmatpush.msra.mxu0 %v28_v3 }
   0xa   :  { %38 = vmatpush.msra.mxu0 %v27_v4 }
   0xc   :  { %39 = vmatpush.msra.mxu0 %v26_v5 }
   0xe   :  { %40 = vmatpush.msra.mxu0 %v25_v6 }
  0x10   :  { %41 = vmatpush.msra.mxu0 %v24_v7 }
  0x12   :  { %42 = vmatpush.msra.mxu0 %v23_v8 }
  0x14   :  { %43 = vmatpush.msra.mxu0 %v22_v9 }
  0x16   :  { %44 = vmatpush.msra.mxu0 %v21_v10 }
  0x18   :  { %45 = vmatpush.msra.mxu0 %v20_v11 }
  0x1a   :  { %46 = vmatpush.msra.mxu0 %v19_v12 }
  0x1c   :  { %47 = vmatpush.msra.mxu0 %v18_v13 }
  0x1e   :  { %48 = vmatpush.msra.mxu0 %v17_v14 }
  0x20   :  { %49 = vmatpush.msra.mxu0 %v16_v15 }
  0x21   :  { %50 = vmatmul.f32.vlgmr.msra.gmra.mxu0 %v15_v16 }
  0x9e   :  { %v51_v18 = vpop.f32.mrf.mxu0 }
  0x9f   :  { %v52_v19 = vadd.f32 %v51_v18, %v33_v17 }
  0xa1   :  { %55 = vst.msk [vmem:[%s140_s3] sm:$0xff] %vm54_vm0, %v52_v19 }

</bundles_post_ra>
